<compile_context>
chip_gen: v7x
topology: tpu7x:2x2x1
jax: 0.10.0
libtpu: 0.0.40
codegen_flags: <defaults>
</compile_context>

<pallas_src>
import jax
import jax.numpy as jnp
from jax.experimental import pallas as pl
from jax.experimental.pallas import tpu as pltpu


def _lstm_kernel(x_ref, wih_ref, whh_ref, b_ref, qlen_ref, c_ref, xp_ref):
    # x_ref   : (T*Bp, E)   time-major tanh-input (pre-tanh embeddings)
    # wih_ref : (E, 4H)     whh_ref: (H, 4H)     b_ref: (1, 4H)
    # qlen_ref: (Bp, 1) int32
    # c_ref   : (Bp, H)     output final cell state
    # xp_ref  : (T*Bp, 4H)  VMEM scratch for the batched input projection
    TB, _ = x_ref.shape
    Bp, H = c_ref.shape
    T = TB // Bp

    # tanh(dropout(embedded)) with p=0.0, then the input projection for all
    # timesteps as one batched MXU matmul (hoisted out of the sequential loop).
    x = jnp.tanh(x_ref[...].astype(jnp.float32))
    xp_ref[...] = (
        jnp.dot(x, wih_ref[...], preferred_element_type=jnp.float32) + b_ref[...]
    )

    qlen = qlen_ref[...]  # (Bp, 1) int32

    def step(t, carry):
        h, c = carry
        row = pl.multiple_of(t * Bp, Bp)
        gates = xp_ref[pl.ds(row, Bp), :] + jnp.dot(
            h, whh_ref[...], preferred_element_type=jnp.float32
        )  # (Bp, 4H), PyTorch gate order [i, f, g, o]
        i = jax.nn.sigmoid(gates[:, 0 * H:1 * H])
        f = jax.nn.sigmoid(gates[:, 1 * H:2 * H])
        g = jnp.tanh(gates[:, 2 * H:3 * H])
        o = jax.nn.sigmoid(gates[:, 3 * H:4 * H])
        c_new = f * c + i * g
        h_new = o * jnp.tanh(c_new)
        valid = t < qlen  # (Bp, 1) bool -> freeze state once past the sequence end
        return jnp.where(valid, h_new, h), jnp.where(valid, c_new, c)

    h0 = jnp.zeros((Bp, H), jnp.float32)
    c0 = jnp.zeros((Bp, H), jnp.float32)
    _, c_final = jax.lax.fori_loop(0, T, step, (h0, c0))
    c_ref[...] = c_final.astype(c_ref.dtype)


def text_processor_forward(q_ids, q_len, emb_table, w_ih, w_hh, b_ih, b_hh):
    """q_ids: [B, T] int32 token ids, q_len: [B] lengths.  Returns [B, H] final cell state."""
    B, T = q_ids.shape
    _, E = emb_table.shape
    H = w_hh.shape[1]

    Bp = max(8, ((B + 7) // 8) * 8)  # pad batch to a sublane multiple

    # TODO(synk): embedding row-gather is done in the wrapper; an in-kernel version
    # would need per-token DMA gather from HBM.
    emb_tm = jnp.take(emb_table, q_ids.T, axis=0)             # (T, B, E), time-major
    emb_tm = jnp.pad(emb_tm, ((0, 0), (0, Bp - B), (0, 0)))   # (T, Bp, E)
    x_flat = emb_tm.reshape(T * Bp, E)

    qlen_p = jnp.pad(q_len.astype(jnp.int32), (0, Bp - B)).reshape(Bp, 1)

    wih_t = w_ih.T                       # (E, 4H)
    whh_t = w_hh.T                       # (H, 4H)
    bias = (b_ih + b_hh).reshape(1, 4 * H)

    c = pl.pallas_call(
        _lstm_kernel,
        out_shape=jax.ShapeDtypeStruct((Bp, H), jnp.float32),
        grid_spec=pltpu.PrefetchScalarGridSpec(
            num_scalar_prefetch=0,
            grid=(1,),
            in_specs=[
                pl.BlockSpec((T * Bp, E), lambda i: (0, 0)),
                pl.BlockSpec((E, 4 * H), lambda i: (0, 0)),
                pl.BlockSpec((H, 4 * H), lambda i: (0, 0)),
                pl.BlockSpec((1, 4 * H), lambda i: (0, 0)),
                pl.BlockSpec((Bp, 1), lambda i: (0, 0)),
            ],
            out_specs=pl.BlockSpec((Bp, H), lambda i: (0, 0)),
            scratch_shapes=[pltpu.VMEM((T * Bp, 4 * H), jnp.float32)],
        ),
        compiler_params=pltpu.CompilerParams(dimension_semantics=("arbitrary",)),
    )(x_flat, wih_t, whh_t, bias, qlen_p)

    return c[:B]


def text_processor_reference(q_ids, q_len, emb_table, w_ih, w_hh, b_ih, b_hh):
    """Pure-JAX reference matching the PyTorch module semantics."""
    B, T = q_ids.shape
    H = w_hh.shape[1]
    x = jnp.tanh(emb_table[q_ids])  # (B, T, E)
    h = jnp.zeros((B, H), jnp.float32)
    c = jnp.zeros((B, H), jnp.float32)
    for t in range(T):
        gates = x[:, t, :] @ w_ih.T + b_ih + h @ w_hh.T + b_hh
        i, f, g, o = jnp.split(gates, 4, axis=1)
        i = jax.nn.sigmoid(i)
        f = jax.nn.sigmoid(f)
        g = jnp.tanh(g)
        o = jax.nn.sigmoid(o)
        c_new = f * c + i * g
        h_new = o * jnp.tanh(c_new)
        valid = (t < q_len)[:, None]
        c = jnp.where(valid, c_new, c)
        h = jnp.where(valid, h_new, h)
    return c


if __name__ == "__main__":
    # small shapes consistent with the module
    B, T = 2, 8          # batch, sequence length
    V, E = 100, 50       # vocab size, embedding dim (pretrained_embedding shape)
    H = 32               # lstm_features

    key = jax.random.PRNGKey(0)
    k_emb, k_ids, k_ih, k_hh = jax.random.split(key, 4)

    emb_table = jax.random.normal(k_emb, (V, E), dtype=jnp.float32) * 0.1
    q_ids = jax.random.randint(k_ids, (B, T), 0, V, dtype=jnp.int32)
    q_len = jnp.array([8, 5], dtype=jnp.int32)  # sorted descending, as pack_padded_sequence expects

    # LSTM parameters (biases zeroed, as in the module __init__)
    w_ih = jax.random.normal(k_ih, (4 * H, E), dtype=jnp.float32) * 0.1
    w_hh = jax.random.normal(k_hh, (4 * H, H), dtype=jnp.float32) * 0.1
    b_ih = jnp.zeros((4 * H,), dtype=jnp.float32)
    b_hh = jnp.zeros((4 * H,), dtype=jnp.float32)

    out = text_processor_forward(q_ids, q_len, emb_table, w_ih, w_hh, b_ih, b_hh)
    out = jax.block_until_ready(out)

    ref = text_processor_reference(q_ids, q_len, emb_table, w_ih, w_hh, b_ih, b_hh)
    assert out.shape == (B, H)
    assert jnp.allclose(out, ref, atol=1e-4, rtol=1e-4)

    print("KERNEL_OK")
</pallas_src>

<mosaic_0001>
module attributes {stable_mosaic.version = 11 : i64} {
  func.func @_lstm_kernel(%arg0: i32, %arg1: memref<64x50xf32, #tpu.memory_space<vmem>>, %arg2: memref<50x128xf32, #tpu.memory_space<vmem>>, %arg3: memref<32x128xf32, #tpu.memory_space<vmem>>, %arg4: memref<1x128xf32, #tpu.memory_space<vmem>>, %arg5: memref<8x1xi32, #tpu.memory_space<vmem>>, %arg6: memref<8x32xf32, #tpu.memory_space<vmem>>, %arg7: memref<64x128xf32, #tpu.memory_space<vmem>>) attributes {dimension_semantics = [#tpu.dimension_semantics<arbitrary>], iteration_bounds = array<i64: 1>, scalar_prefetch = 0 : i64, scratch_operands = 1 : i64, tpu.core_type = #tpu.core_type<tc>, window_params = [{pipeline_mode = #tpu.pipeline_mode<synchronous>, transform_indices = @transform_0, window_bounds = array<i64: 64, 50>}, {pipeline_mode = #tpu.pipeline_mode<synchronous>, transform_indices = @transform_1, window_bounds = array<i64: 50, 128>}, {pipeline_mode = #tpu.pipeline_mode<synchronous>, transform_indices = @transform_2, window_bounds = array<i64: 32, 128>}, {pipeline_mode = #tpu.pipeline_mode<synchronous>, transform_indices = @transform_3, window_bounds = array<i64: 1, 128>}, {pipeline_mode = #tpu.pipeline_mode<synchronous>, transform_indices = @transform_4, window_bounds = array<i64: 8, 1>}, {pipeline_mode = #tpu.pipeline_mode<synchronous>, transform_indices = @transform_5, window_bounds = array<i64: 8, 32>}]} {
    %c0 = arith.constant 0 : index
    %c0_0 = arith.constant 0 : index
    %0 = vector.load %arg1[%c0, %c0_0] : memref<64x50xf32, #tpu.memory_space<vmem>>, vector<64x50xf32>
    %1 = math.tanh %0 : vector<64x50xf32>
    %c0_1 = arith.constant 0 : index
    %c0_2 = arith.constant 0 : index
    %2 = vector.load %arg2[%c0_1, %c0_2] : memref<50x128xf32, #tpu.memory_space<vmem>>, vector<50x128xf32>
    %cst = arith.constant dense<0.000000e+00> : vector<64x128xf32>
    %3 = tpu.matmul %1, %2, %cst {dimension_numbers = #tpu.dot_dimension_numbers<[1], [0], [0], [1], [0, 0, 1, 1], [], []>} : vector<64x50xf32>, vector<50x128xf32>, vector<64x128xf32> -> vector<64x128xf32>
    %c0_3 = arith.constant 0 : index
    %c0_4 = arith.constant 0 : index
    %4 = vector.load %arg4[%c0_3, %c0_4] : memref<1x128xf32, #tpu.memory_space<vmem>>, vector<1x128xf32>
    %5 = vector.broadcast %4 : vector<1x128xf32> to vector<64x128xf32>
    %6 = arith.addf %3, %5 : vector<64x128xf32>
    %c0_5 = arith.constant 0 : index
    %c0_6 = arith.constant 0 : index
    %7 = vector.load %arg7[%c0_5, %c0_6] : memref<64x128xf32, #tpu.memory_space<vmem>>, vector<64x128xf32>
    tpu.vector_store %arg7[%c0_5, %c0_6], %6 {strides = array<i32>} : memref<64x128xf32, #tpu.memory_space<vmem>>, vector<64x128xf32>,
    %c0_7 = arith.constant 0 : index
    %c0_8 = arith.constant 0 : index
    %8 = vector.load %arg5[%c0_7, %c0_8] : memref<8x1xi32, #tpu.memory_space<vmem>>, vector<8x1xi32>
    %cst_9 = arith.constant 0.000000e+00 : f32
    %9 = vector.broadcast %cst_9 : f32 to vector<8x32xf32>
    %cst_10 = arith.constant 0.000000e+00 : f32
    %10 = vector.broadcast %cst_10 : f32 to vector<8x32xf32>
    %c0_i32 = arith.constant 0 : i32
    %c8_i32 = arith.constant 8 : i32
    %11 = arith.addi %c0_i32, %c8_i32 : i32
    %c1_i32 = arith.constant 1 : i32
    %12:2 = scf.for %arg8 = %c0_i32 to %11 step %c1_i32 iter_args(%arg9 = %9, %arg10 = %10) -> (vector<8x32xf32>, vector<8x32xf32>)  : i32 {
      %c8_i32_14 = arith.constant 8 : i32
      %14 = arith.muli %arg8, %c8_i32_14 : i32
      %15 = tpu.assume_multiple %14, 8 : i32
      %16 = arith.index_cast %15 : i32 to index
      %c0_15 = arith.constant 0 : index
      %17 = vector.load %arg7[%16, %c0_15] : memref<64x128xf32, #tpu.memory_space<vmem>>, vector<8x128xf32>
      %c0_16 = arith.constant 0 : index
      %c0_17 = arith.constant 0 : index
      %18 = vector.load %arg3[%c0_16, %c0_17] : memref<32x128xf32, #tpu.memory_space<vmem>>, vector<32x128xf32>
      %cst_18 = arith.constant dense<0.000000e+00> : vector<8x128xf32>
      %19 = tpu.matmul %arg9, %18, %cst_18 {dimension_numbers = #tpu.dot_dimension_numbers<[1], [0], [0], [1], [0, 0, 1, 1], [], []>} : vector<8x32xf32>, vector<32x128xf32>, vector<8x128xf32> -> vector<8x128xf32>
      %20 = arith.addf %17, %19 : vector<8x128xf32>
      %21 = vector.extract_strided_slice %20 {offsets = [0, 0], sizes = [8, 32], strides = [1, 1]} : vector<8x128xf32> to vector<8x32xf32>
      %22 = arith.negf %21 : vector<8x32xf32>
      %23 = math.exp %22 : vector<8x32xf32>
      %cst_19 = arith.constant 1.000000e+00 : f32
      %24 = vector.broadcast %cst_19 : f32 to vector<8x32xf32>
      %25 = arith.addf %24, %23 : vector<8x32xf32>
      %26 = arith.divf %24, %25 : vector<8x32xf32>
      %27 = vector.extract_strided_slice %20 {offsets = [0, 32], sizes = [8, 32], strides = [1, 1]} : vector<8x128xf32> to vector<8x32xf32>
      %28 = arith.negf %27 : vector<8x32xf32>
      %29 = math.exp %28 : vector<8x32xf32>
      %cst_20 = arith.constant 1.000000e+00 : f32
      %30 = vector.broadcast %cst_20 : f32 to vector<8x32xf32>
      %31 = arith.addf %30, %29 : vector<8x32xf32>
      %32 = arith.divf %30, %31 : vector<8x32xf32>
      %33 = vector.extract_strided_slice %20 {offsets = [0, 64], sizes = [8, 32], strides = [1, 1]} : vector<8x128xf32> to vector<8x32xf32>
      %34 = math.tanh %33 : vector<8x32xf32>
      %35 = vector.extract_strided_slice %20 {offsets = [0, 96], sizes = [8, 32], strides = [1, 1]} : vector<8x128xf32> to vector<8x32xf32>
      %36 = arith.negf %35 : vector<8x32xf32>
      %37 = math.exp %36 : vector<8x32xf32>
      %cst_21 = arith.constant 1.000000e+00 : f32
      %38 = vector.broadcast %cst_21 : f32 to vector<8x32xf32>
      %39 = arith.addf %38, %37 : vector<8x32xf32>
      %40 = arith.divf %38, %39 : vector<8x32xf32>
      %41 = arith.mulf %32, %arg10 : vector<8x32xf32>
      %42 = arith.mulf %26, %34 : vector<8x32xf32>
      %43 = arith.addf %41, %42 : vector<8x32xf32>
      %44 = math.tanh %43 : vector<8x32xf32>
      %45 = arith.mulf %40, %44 : vector<8x32xf32>
      %46 = vector.broadcast %arg8 : i32 to vector<8x1xi32>
      %47 = arith.cmpi slt, %46, %8 : vector<8x1xi32>
      %48 = vector.shape_cast %47 : vector<8x1xi1> to vector<8x1xi1>
      %49 = vector.broadcast %48 : vector<8x1xi1> to vector<8x32xi1>
      %50 = arith.select %49, %45, %arg9 : vector<8x32xi1>, vector<8x32xf32>
      %51 = vector.shape_cast %47 : vector<8x1xi1> to vector<8x1xi1>
      %52 = vector.broadcast %51 : vector<8x1xi1> to vector<8x32xi1>
      %53 = arith.select %52, %43, %arg10 : vector<8x32xi1>, vector<8x32xf32>
      scf.yield %50, %53 : vector<8x32xf32>, vector<8x32xf32>
    }
    %c8_i32_11 = arith.constant 8 : i32
    %c0_12 = arith.constant 0 : index
    %c0_13 = arith.constant 0 : index
    %13 = vector.load %arg6[%c0_12, %c0_13] : memref<8x32xf32, #tpu.memory_space<vmem>>, vector<8x32xf32>
    tpu.vector_store %arg6[%c0_12, %c0_13], %12#1 {strides = array<i32>} : memref<8x32xf32, #tpu.memory_space<vmem>>, vector<8x32xf32>,
    return
  }
  func.func @transform_0(%arg0: i32) -> (i32, i32) {
    %c0_i32 = arith.constant 0 : i32
    %c0_i32_0 = arith.constant 0 : i32
    %c0_i32_1 = arith.constant 0 : i32
    return %c0_i32, %c0_i32_0 : i32, i32
  }
  func.func @transform_1(%arg0: i32) -> (i32, i32) {
    %c0_i32 = arith.constant 0 : i32
    %c0_i32_0 = arith.constant 0 : i32
    %c0_i32_1 = arith.constant 0 : i32
    return %c0_i32, %c0_i32_0 : i32, i32
  }
  func.func @transform_2(%arg0: i32) -> (i32, i32) {
    %c0_i32 = arith.constant 0 : i32
    %c0_i32_0 = arith.constant 0 : i32
    %c0_i32_1 = arith.constant 0 : i32
    return %c0_i32, %c0_i32_0 : i32, i32
  }
  func.func @transform_3(%arg0: i32) -> (i32, i32) {
    %c0_i32 = arith.constant 0 : i32
    %c0_i32_0 = arith.constant 0 : i32
    %c0_i32_1 = arith.constant 0 : i32
    return %c0_i32, %c0_i32_0 : i32, i32
  }
  func.func @transform_4(%arg0: i32) -> (i32, i32) {
    %c0_i32 = arith.constant 0 : i32
    %c0_i32_0 = arith.constant 0 : i32
    %c0_i32_1 = arith.constant 0 : i32
    return %c0_i32, %c0_i32_0 : i32, i32
  }
  func.func @transform_5(%arg0: i32) -> (i32, i32) {
    %c0_i32 = arith.constant 0 : i32
    %c0_i32_0 = arith.constant 0 : i32
    %c0_i32_1 = arith.constant 0 : i32
    return %c0_i32, %c0_i32_0 : i32, i32
  }
}

</mosaic_0001>

<bundles_post_ra>
// kernel: tpu_custom_call.1
= control target key start
LH: loop header
LB: loop body
LE: loop exit
PB: predicated region body
PF: predicated region fallthrough
CT: control target
= control target key end

     0   :  { %10 = vsyncpa [#allocation4], 0  ;;  %vm76_vm0 = vcmask 1041408   ;;  %vm51_vm1 = vcmask 408576   ;;  %v653_v44 = vmov 0.0   ;;  %v655_v45 = vmov 0.0   ;;  %s702_s0 = inlined_call_operand.vmem [shape: f32[64,50], index: 0, kind: input, shape index: {}]   ;;  %s703_s1 = inlined_call_operand.vmem [shape: f32[50,128], index: 1, kind: input, shape index: {}]   ;;  %s704_s2 = inlined_call_operand.vmem [shape: f32[32,128], index: 2, kind: input, shape index: {}]   ;;  %s705_s3 = inlined_call_operand.vmem [shape: f32[1,128], index: 3, kind: input, shape index: {}]   ;;  %s706_s4 = inlined_call_operand.vmem [shape: s32[8,1], index: 4, kind: input, shape index: {}]   ;;  %s707_s5 = inlined_call_operand.hbm [shape: f32[8,32], index: 5, kind: output, shape index: {}]  }
   0x1   :  { %v37_v0 = vld [vmem:[%s703_s1] sm:$0xff]  ;;  %v38_v1 = vld [vmem:[%s703_s1 + $0x8] sm:$0xff]  ;;  %v39_v3 = vld [vmem:[%s703_s1 + $0x10] sm:$0xff] }
   0x2   :  { %v422_v2 = vpack.c.bf16 %v38_v1, %v37_v0  ;;  %v40_v4 = vld [vmem:[%s703_s1 + $0x18] sm:$0xff]  ;;  %v41_v6 = vld [vmem:[%s703_s1 + $0x20] sm:$0xff]  ;;  %v42_v7 = vld [vmem:[%s703_s1 + $0x28] sm:$0xff] }
   0x3   :  { %v426_v5 = vpack.c.bf16 %v40_v4, %v39_v3  ;;  %v21_v8 = vld [vmem:[%s702_s0] sm:$0xff]  ;;  %v22_v10 = vld [vmem:[%s702_s0 + $0x8] sm:$0xff]  ;;  %v23_v12 = vld [vmem:[%s702_s0 + $0x10] sm:$0xff]  ;;  %v430_v13 = vpack.c.bf16 %v42_v7, %v41_v6 }
   0x4   :  { %423 = vmatprep.subr.bf16.mxu0 %v422_v2  ;;  %440 = vmatprep.subr.bf16.mxu1 %v422_v2  ;;  %480 = vtanh.f32 %v21_v8  ;;  %v25_v9 = vld [vmem:[%s702_s0 + $0x20] sm:$0xff]  ;;  %v26_v11 = vld [vmem:[%s702_s0 + $0x28] sm:$0xff]  ;;  %v27_v14 = vld [vmem:[%s702_s0 + $0x30] sm:$0xff] }
   0x5   :  { %425 = vmatpush3.bf16.msra.mxu0 %v422_v2  ;;  %444 = vmatpush3.bf16.msra.mxu1 %v422_v2  ;;  %482 = vtanh.f32 %v25_v9  ;;  %v24_v15 = vld [vmem:[%s702_s0 + $0x18] sm:$0xff]  ;;  %v43_v17 = vld [vmem:[%s703_s1 + $0x30] sm:$0x3]  ;;  %v648_v26 = vld [vmem:[%s706_s4] sm:$0xff] }
   0x6   :  { %427 = vmatprep.subr.bf16.mxu0 %v426_v5  ;;  %441 = vmatprep.subr.bf16.mxu1 %v426_v5  ;;  %484 = vtanh.f32 %v22_v10  ;;  %v28_v16 = vld [vmem:[%s702_s0 + $0x38] sm:$0xff]  ;;  %v352_v27 = vld [vmem:[%s705_s3] ss:$0 sm:$0xff]  ;;  %s657_s3 = smov 0  }
   0x7   :  { %486 = vtanh.f32 %v26_v11 }
   0x8   :  { %488 = vtanh.f32 %v23_v12 }
   0x9   :  { %429 = vmatpush3.bf16.msra.mxu0 %v426_v5  ;;  %445 = vmatpush3.bf16.msra.mxu1 %v426_v5  ;;  %490 = vtanh.f32 %v27_v14 }
   0xa   :  { %431 = vmatprep.subr.bf16.mxu0 %v430_v13  ;;  %442 = vmatprep.subr.bf16.mxu1 %v430_v13  ;;  %492 = vtanh.f32 %v24_v15 }
   0xb   :  { %494 = vtanh.f32 %v28_v16 }
   0xd   :  { %433 = vmatpush3.bf16.msra.mxu0 %v430_v13  ;;  %446 = vmatpush3.bf16.msra.mxu1 %v430_v13 }
   0xe   :  { %v481_v18 = vpop.eup %480  ;;  %397 = vmatprep.subr.msk.mxu0 %vm76_vm0, %v43_v17  ;;  %443 = vmatprep.subr.msk.mxu1 %vm76_vm0, %v43_v17 }
   0xf   :  { %v483_v19 = vpop.eup %482  ;;  %399 = vmatprep.mubr.msk.f32.mxu0 %vm51_vm1, %v481_v18 }
  0x10   :  { %v485_v20 = vpop.eup %484  ;;  %405 = vmatprep.mubr.msk.f32.mxu1 %vm51_vm1, %v483_v19 }
  0x11   :  { %v487_v21 = vpop.eup %486  ;;  %398 = vmatpush3.msk.msra.mxu0 %vm76_vm0, %v43_v17  ;;  %447 = vmatpush3.msk.msra.mxu1 %vm76_vm0, %v43_v17 }
  0x12   :  { %v489_v22 = vpop.eup %488  ;;  %400 = vmatmul.mubr.msk.f32.vlgmr.msra.gmra.mrb[0].mxu0 %vm51_vm1, %v485_v20  ;;  %406 = vmatmul.mubr.msk.f32.vlgmr.msra.gmra.mrb[0].mxu1 %vm51_vm1, %v487_v21 }
  0x13   :  { %v491_v23 = vpop.eup %490  ;;  %402 = vmatprep.mubr.msk.f32.mxu0 %vm51_vm1, %v489_v22 }
  0x14   :  { %v493_v24 = vpop.eup %492  ;;  %408 = vmatprep.mubr.msk.f32.mxu1 %vm51_vm1, %v491_v23 }
  0x15   :  { %v495_v25 = vpop.eup %494 }
  0x16   :  { %403 = vmatmul.mubr.msk.f32.gmra.mrb[2].mxu0 %vm51_vm1, %v493_v24  ;;  %409 = vmatmul.mubr.msk.f32.gmra.mrb[2].mxu1 %vm51_vm1, %v495_v25 }
  0xe5   :  { %v401_v28 = vpop.f32.mrb[0].mxu0  ;;  %v407_v29 = vpop.f32.mrb[0].mxu1 }
  0xe6   :  { %v152_v30 = vadd.f32 %v401_v28, %v352_v27  ;;  %v172_v31 = vadd.f32 %v407_v29, %v352_v27  ;;  %v146_v32 = vpop.f32.mrb[1].mxu0  ;;  %v166_v33 = vpop.f32.mrb[1].mxu1 }
  0xe7   :  { %v147_v34 = vadd.f32 %v352_v27, %v146_v32  ;;  %v167_v35 = vadd.f32 %v352_v27, %v166_v33 }
  0xe8   :  { %186 = vst [vmem:[#allocation2 + $0x8] sm:$0xff] %v152_v30  ;;  %190 = vst [vmem:[#allocation2 + $0x28] sm:$0xff] %v172_v31 }
  0xe9   :  { %185 = vst [vmem:[#allocation2] sm:$0xff] %v147_v34  ;;  %189 = vst [vmem:[#allocation2 + $0x20] sm:$0xff] %v167_v35  ;;  %v404_v36 = vpop.f32.mrb[2].mxu0  ;;  %v410_v37 = vpop.f32.mrb[2].mxu1 }
  0xea   :  { %v162_v38 = vadd.f32 %v404_v36, %v352_v27  ;;  %v182_v39 = vadd.f32 %v410_v37, %v352_v27  ;;  %v156_v40 = vpop.f32.mrb[3].mxu0  ;;  %v176_v41 = vpop.f32.mrb[3].mxu1 }
  0xeb   :  { %v157_v42 = vadd.f32 %v352_v27, %v156_v40  ;;  %v177_v43 = vadd.f32 %v352_v27, %v176_v41 }
  0xec   :  { %188 = vst [vmem:[#allocation2 + $0x18] sm:$0xff] %v162_v38  ;;  %192 = vst [vmem:[#allocation2 + $0x38] sm:$0xff] %v182_v39 }
  0xed   :  { %187 = vst [vmem:[#allocation2 + $0x10] sm:$0xff] %v157_v42  ;;  %191 = vst [vmem:[#allocation2 + $0x30] sm:$0xff] %v177_v43 }
  0xee LB: > { %v205_v46 = vld [vmem:[%s704_s2] sm:$0xff]  ;;  %v206_v47 = vld [vmem:[%s704_s2 + $0x8] sm:$0xff]  ;;  %v207_v48 = vld [vmem:[%s704_s2 + $0x10] sm:$0xff]  ;;  %v554_v49 = vmov 0.0|0.0   ;;  %s555_s7 = smov 32   ;;  %vm556_vm2 = vmmov 0   ;;  %v310_v0 = vstv %s552_s3  ;;  %s552_s3 = sphi %s657_s3, %s199_s3   ;;  %v548_v45 = vphi %v655_v45, %v317_v45   ;;  %v544_v44 = vphi %v653_v44, %v708_v44  }
  0xef   : > { %434 = vmatprep.subr.bf16.mxu0 %v554_v49  ;;  %v435_v50 = vpack.c.bf16 %v206_v47, %v205_v46  ;;  %v208_v51 = vld [vmem:[%s704_s2 + $0x18] sm:$0xff]  ;;  %210 = vrot.lane.b32.xlu0 %v548_v45, %s555_s7  ;;  %v557_v52 = vmov 0.0   ;;  %vm212_vm3 = vcmask 261120   ;;  %s362_s8 = sshll.u32 %s552_s3, 3  ;;  %v558_v59 = vmov 0   ;;  %s559_s10 = smov 64  }
  0xf0   : > { %419 = vmatprep.mubr.msk.f32.mxu0 %vm556_vm2, %v557_v52  ;;  %v438_v53 = vpack.c.bf16 %v208_v51, %v207_v48  ;;  %s203_s9 = scalar_lea.vmem [#allocation2], %s362_s8  ;;  %496 = vset.pattern.permute.xlu1 %v558_v59  ;;  %vm311_vm4 = vcmp.lt.s32.totalorder %v310_v0, %v648_v26  ;;  %s199_s3 = sadd.s32 1, %s552_s3  }
  0xf1   : > { %436 = vmatpush3.bf16.msra.mxu0 %v435_v50  ;;  %497 = vset.pattern.permute.xlu0 %v558_v59  ;;  %v312_v4 = vsel %vm311_vm4, 1, %v558_v59  ;;  %p196_p0 = scmp.ge.s32.totalorder %s199_s3, 8  }
  0xf2   : > { %437 = vmatprep.subr.bf16.mxu0 %v554_v49  ;;  %s560_s11 = smov (%p196_p0), 96   ;;  %s561_s12 = smov (%p196_p0), [#allocation3]  }
  0xf3   :  { %s331_s13 = sshll.u32 (%p196_p0), %s561_s12, 4  ;;  %s332_s13 = int_to_ptr.vmem [resolvable:$true] %s331_s13 }
  0xf4   : > { %v204_v55 = vld [vmem:[%s203_s9] sm:$0xff]  ;;  %s506_s14 = scalar_lea.vmem (%p196_p0), %s332_s13, 128  ;;  %p511_p2 = scmp.lt.s32.totalorder (%p196_p0), %s332_s13, %s332_s13 }
  0xf5   : > { %439 = vmatpush3.bf16.msra.mxu0 %v438_v53  ;;  %p507_p1 = scmp.ne.s32.totalorder (%p196_p0), %s332_s13, %s506_s14  ;;  %p512_p3 = scmp.lt.s32.totalorder (%p196_p0), %s506_s14, %s506_s14 }
  0xf7   :  { %p513_p4 = por (%p196_p0), %p512_p3, %p511_p2 }
  0xf9   :  { %p514_p5 = pnand (%p196_p0), %p513_p4, %p507_p1 }
 0x161   : > { %v211_v54 = vpop.permute.xlu0 %210 }
 0x162   : > { %420 = vmatmul.mubr.msk.f32.vlgmr.msra.gmra.mrb[0].mxu0 %vm212_vm3, %v211_v54 }
 0x235   : > { %v281_v56 = vpop.f32.mrb[0].mxu0 }
 0x236   : > { %v285_v57 = vadd.f32 %v281_v56, %v204_v55  ;;  %v421_v58 = vpop.f32.mrb[1].mxu0 }
 0x238   : > { %498 = vtanh.f32 %v285_v57  ;;  %v364_v61 = vmul.f32 -1.442695, %v285_v57 }
 0x23a   : > { %500 = vpow2.f32 %v364_v61 }
 0x242   : > { %v499_v60 = vpop.eup %498 }
 0x243   : > { %295 = vrot.lane.b32.xlu0 %v499_v60, %s559_s10 }
 0x244   : > { %v501_v62 = vpop.eup %500 }
 0x245   : > { %v289_v63 = vadd.f32 1.0, %v501_v62 }
 0x247   : > { %502 = vrcp.f32 %v289_v63 }
 0x251   : > { %v503_v1 = vpop.eup %502 }
 0x252   : > { %v293_v5 = vmul.f32 %v544_v44, %v503_v1 }
 0x2b5   : > { %v296_v2 = vpop.permute.xlu0 %295 }
 0x2b6   : > { %v298_v3 = vmul.f32 %v503_v1, %v296_v2 }
 0x2b8   : > { %300 = vrot.lane.b32.xlu1 %v298_v3, %s555_s7 }
 0x2bc   : > { %314 = vperm.xlu1 %496, %v312_v4  }
 0x32a   : > { %v301_v6 = vpop.permute.xlu1 %300 }
 0x32b   : > { %v303_v7 = vadd.f32 %v301_v6, %v293_v5 }
 0x32d   : > { %504 = vtanh.f32 %v303_v7 }
 0x337   : > { %v505_v8 = vpop.eup %504 }
 0x338   : > { %306 = vrot.lane.b32.xlu0 %v505_v8, %s559_s10 }
 0x33b   : > { %v315_v9 = vpop.permute.xlu1 %314 }
 0x33c   : > { %vm316_vm5 = vcmp.eq.s32.totalorder %v315_v9, 1 }
 0x33d   : > { %v318_v10 = vsel %vm316_vm5, %v303_v7, %v544_v44  }
 0x33e   : > { %v708_v44 = vmov %v318_v10  ;;  %320 = vrot.lane.b32.xlu0 (%p196_p0), %v318_v10, %s560_s11 }
 0x3a7   :  { %198 = sbr.rel (!%p196_p0) target bundleno = 238 (0xee), region = 48 }
 0x3aa   : > { %v307_v11 = vpop.permute.xlu0 %306 }
 0x3ab   : > { %v309_v12 = vmul.f32 %v503_v1, %v307_v11 }
 0x3ad   : > { %v317_v45 = vsel %vm316_vm5, %v309_v12, %v548_v45  }
 0x3b0   :  { %v321_v13 = vpop.permute.xlu0 %320 }
 0x3b1   :  { %324 = vst.msk [vmem:[#allocation3] sm:$0xff] %vm212_vm3, %v321_v13 }
 0x3b2   :  { %517 = shalt.err (!%p514_p5)
}
 0x3b3   :  { %s518_s17 = scalar_lea.hbm %s707_s5, 128 }
 0x3b4   :  { %p519_p6 = scmp.ne.s32.totalorder %s707_s5, %s518_s17  ;;  %p522_p7 = scmp.lt.u32.totalorder %s518_s17, %s707_s5 }
 0x3b6   :  { %p524_p8 = pnand %p522_p7, %p519_p6 }
 0x3b8   :  { %527 = shalt.err (!%p524_p8)
}
 0x3b9   :  { %334 = dma.vmem_to_hbm [thread:$0]  %s332_s13, 128, %s707_s5, [#allocation4]  }
 0x3ba   :  { %540 = dma.done.wait [#allocation4], 128  }
 0x3bb   :  { %541 = vsyncadd [#allocation4], 4294967168 }
 0x3bc   :  { %338 = vsyncpa [#allocation4], 1 }

</bundles_post_ra>
